<compile_context>
chip_gen: v6e
topology: v6e:2x2x1
jax: 0.10.0
libtpu: 0.0.40
codegen_flags: <defaults>
</compile_context>

<pallas_src>
import math
from functools import partial
from typing import NamedTuple

import jax
import jax.numpy as jnp
from jax import lax
from jax.experimental import pallas as pl
from jax.experimental.pallas import tpu as pltpu

_SQRT1_2 = 1.0 / math.sqrt(2.0)
_SQRT_2_OVER_PI = math.sqrt(2.0 / math.pi)
_LANE = 128


def _round_up(v: int, m: int) -> int:
    return (v + m - 1) // m * m


def _pad2(a, rows: int, cols: int):
    r, c = a.shape
    if r == rows and c == cols:
        return a
    return jnp.pad(a, ((0, rows - r), (0, cols - c)))


class PreparedMLP(NamedTuple):
    """Padded (lane-dense) + compute-dtype-cast parameters, built once per layer."""
    w1: jax.Array     # (C_in_p, H_p)   compute dtype
    b1: jax.Array     # (1, H_p)        f32
    w2: jax.Array     # (H_p, C_out_p)  compute dtype
    b2: jax.Array     # (1, C_out_p)    f32
    c_in: int
    hidden: int
    c_out: int


def prepare_mlp_params(w1, b1, w2, b2, compute_dtype=jnp.bfloat16) -> PreparedMLP:
    """Hoistable per-layer prep: zero-pad channels to multiples of 128 (exact
    for fc1/GELU/fc2) and cast weights to the MXU compute dtype once."""
    C_in, H = w1.shape
    H2, C_out = w2.shape
    assert H2 == H and b1.shape == (H,) and b2.shape == (C_out,)
    C_in_p, H_p, C_out_p = (_round_up(d, _LANE) for d in (C_in, H, C_out))
    w1p = _pad2(w1, C_in_p, H_p).astype(compute_dtype)
    w2p = _pad2(w2, H_p, C_out_p).astype(compute_dtype)
    b1p = _pad2(b1.reshape(1, H), 1, H_p).astype(jnp.float32)
    b2p = _pad2(b2.reshape(1, C_out), 1, C_out_p).astype(jnp.float32)
    return PreparedMLP(w1p, b1p, w2p, b2p, C_in, H, C_out)


def _mlp_kernel(x_ref, w1_ref, b1_ref, w2_ref, b2_ref, o_ref, acc_ref, *,
                hk: int, gelu_approximate: bool):
    # x_ref : (TM, Cin_p)   native dtype (cast to compute dtype here, in-kernel)
    # w1_ref: (Cin_p, H_p)  compute dtype   b1_ref: (1, H_p)      f32
    # w2_ref: (H_p, Cout_p) compute dtype   b2_ref: (1, Cout_p)   f32
    # o_ref : (TM, Cout_p)  out dtype       acc_ref: (TM, Cout_p) f32 scratch
    cdt = w1_ref.dtype
    x = x_ref[...].astype(cdt)
    n_chunks = w1_ref.shape[1] // hk

    def chunk(k, carry):
        off = k * hk
        if not isinstance(off, int):
            off = pl.multiple_of(off, hk)
        # fc1 for this hidden chunk (MXU, f32 accumulation).
        h = jnp.dot(x, w1_ref[:, pl.ds(off, hk)],
                    preferred_element_type=jnp.float32)
        h = h + b1_ref[:, pl.ds(off, hk)]
        if gelu_approximate:
            # tanh GELU -> EUP slot (v6e/v7x: frees the VALU, MXU binds again).
            h = 0.5 * h * (1.0 + jnp.tanh(_SQRT_2_OVER_PI *
                                          (h + 0.044715 * (h * h * h))))
        else:
            # Exact erf GELU (matches torch.nn.GELU default).
            h = 0.5 * h * (1.0 + lax.erf(h * _SQRT1_2))
        # fc2 partial for this chunk, accumulated in f32 VMEM scratch.
        acc_ref[...] += jnp.dot(h.astype(cdt), w2_ref[pl.ds(off, hk), :],
                                preferred_element_type=jnp.float32)
        return carry

    acc_ref[...] = jnp.zeros_like(acc_ref)
    lax.fori_loop(0, n_chunks, chunk, 0, unroll=(n_chunks <= 8))
    o_ref[...] = (acc_ref[...] + b2_ref[...]).astype(o_ref.dtype)


def _vmem_cap_bytes() -> int:
    phys = 0
    try:
        phys = int(getattr(pltpu.get_tpu_info(), "vmem_capacity_bytes", 0))
    except Exception:
        phys = 0
    if phys <= 0:
        phys = 64 * 1024 * 1024            # conservative default (v7x-sized)
    # Never ask for the whole physical VMEM: leave headroom for Mosaic's
    # internal scratch / spill space.  v7x(64MiB) -> 56MiB, v5e/v6e -> 112MiB.
    return max(min(phys - 8 * 1024 * 1024, 112 * 1024 * 1024),
               16 * 1024 * 1024)


def _pick_hidden_chunk(H_p: int, target: int) -> int:
    hk = min(_round_up(max(target, _LANE), _LANE), H_p)
    while H_p % hk:
        hk -= _LANE
    return max(hk, _LANE)


def mlp_pallas(x, w1, b1=None, w2=None, b2=None, *, tile_m=512, hidden_chunk=512,
               compute_dtype=jnp.bfloat16, gelu_approximate=False, out_dtype=None):
    """FPTrans MLP: GELU(x @ w1 + b1) @ w2 + b2.

    x: [B, N, C_in].  Either pass raw (w1 [C_in,H], b1 [H], w2 [H,C_out],
    b2 [C_out]) or a PreparedMLP (from prepare_mlp_params) as the second arg.
    Returns [B, N, C_out] in `out_dtype` (default: x.dtype).
    """
    if isinstance(w1, PreparedMLP):
        p = w1
    else:
        p = prepare_mlp_params(w1, b1, w2, b2, compute_dtype)

    B, N, C_in = x.shape
    assert C_in == p.c_in
    C_in_p, H_p = p.w1.shape
    _, C_out_p = p.w2.shape
    C_out = p.c_out
    out_dtype = jnp.dtype(out_dtype) if out_dtype is not None else x.dtype
    x_item = jnp.dtype(x.dtype).itemsize
    o_item = jnp.dtype(out_dtype).itemsize
    c_item = jnp.dtype(p.w1.dtype).itemsize

    # Sublane granularity of the token tile (16 rows if any 2-byte tile dtype).
    sub = 8 if min(x_item, o_item) >= 4 else 16
    M = B * N

    # Token tiling: big tiles, no explicit M padding (ragged last block is
    # masked by Pallas); ensure >=2 grid steps when possible so both v7x
    # TensorCores get work under dimension_semantics=("parallel",).
    min_steps = 2 if M >= 2 * sub else 1
    tm = min(_round_up(max(tile_m, sub), sub),
             _round_up(pl.cdiv(M, min_steps), sub))
    if tm >= M:
        tm = M                       # single block == full array dim (legal)
    grid = (pl.cdiv(M, tm),)

    hk = _pick_hidden_chunk(H_p, hidden_chunk)

    # Lane-dense channel padding on x only when actually needed (no-op for
    # real ViT dims such as 768); x stays in its native dtype (cast in-kernel).
    x2 = x.reshape(M, C_in)
    if C_in_p != C_in:
        x2 = jnp.pad(x2, ((0, 0), (0, C_in_p - C_in)))

    # Resident VMEM footprint: double-buffered x/out tiles, double-buffered
    # (but never re-DMA'd) weights/biases, f32 accumulator scratch, the
    # in-kernel bf16 copy of x and the live (tm, hk) GELU chunk.
    est = (2 * tm * C_in_p * x_item
           + 2 * tm * C_out_p * o_item
           + 2 * (C_in_p * H_p + H_p * C_out_p) * c_item
           + 2 * 8 * (H_p + C_out_p) * 4
           + tm * C_out_p * 4
           + tm * C_in_p * c_item
           + 2 * tm * hk * 4)
    vmem_limit = int(min(max(est + est // 4 + (2 << 20), 16 << 20),
                         _vmem_cap_bytes()))

    kernel = partial(_mlp_kernel, hk=hk, gelu_approximate=bool(gelu_approximate))

    grid_spec = pltpu.PrefetchScalarGridSpec(
        num_scalar_prefetch=0,
        grid=grid,
        in_specs=[
            pl.BlockSpec((tm, C_in_p), lambda i: (i, 0)),
            # Weights/biases: constant index_map -> DMA'd once, stay resident.
            pl.BlockSpec((C_in_p, H_p), lambda i: (0, 0)),
            pl.BlockSpec((1, H_p), lambda i: (0, 0)),
            pl.BlockSpec((H_p, C_out_p), lambda i: (0, 0)),
            pl.BlockSpec((1, C_out_p), lambda i: (0, 0)),
        ],
        out_specs=pl.BlockSpec((tm, C_out_p), lambda i: (i, 0)),
        scratch_shapes=[pltpu.VMEM((tm, C_out_p), jnp.float32)],
    )

    out2 = pl.pallas_call(
        kernel,
        out_shape=jax.ShapeDtypeStruct((M, C_out_p), out_dtype),
        grid_spec=grid_spec,
        compiler_params=pltpu.CompilerParams(
            dimension_semantics=("parallel",),     # token axis: megacore-shardable
            vmem_limit_bytes=vmem_limit,
        ),
    )(x2, p.w1, p.b1, p.w2, p.b2)

    if C_out_p != C_out:
        out2 = out2[:, :C_out]
    return out2.reshape(B, N, C_out)


def mlp_reference(x, w1, b1, w2, b2, compute_dtype=None, gelu_approximate=False):
    """Pure-JAX reference. With compute_dtype set it mirrors the kernel's
    numerics (low-precision matmul inputs, f32 accumulation, f32 GELU)."""
    if compute_dtype is not None:
        xc, w1c, w2c = (a.astype(compute_dtype) for a in (x, w1, w2))
    else:
        xc, w1c, w2c = x, w1, w2
    h = jnp.einsum("mc,ch->mh", xc.reshape(-1, x.shape[-1]), w1c,
                   preferred_element_type=jnp.float32) + b1
    if gelu_approximate:
        h = 0.5 * h * (1.0 + jnp.tanh(_SQRT_2_OVER_PI * (h + 0.044715 * h ** 3)))
    else:
        h = 0.5 * h * (1.0 + lax.erf(h * _SQRT1_2))
    if compute_dtype is not None:
        h = h.astype(compute_dtype)
    o = jnp.einsum("mh,hc->mc", h, w2c,
                   preferred_element_type=jnp.float32) + b2
    return o.reshape(x.shape[:-1] + (w2.shape[-1],)).astype(x.dtype)


def _make_inputs(key, B, N, C_in, H, C_out):
    kx, k1, k2, k3, k4 = jax.random.split(key, 5)
    x = jax.random.normal(kx, (B, N, C_in), dtype=jnp.float32)
    w1 = jax.random.normal(k1, (C_in, H), dtype=jnp.float32) / math.sqrt(C_in)
    b1 = jax.random.normal(k2, (H,), dtype=jnp.float32) * 0.01
    w2 = jax.random.normal(k3, (H, C_out), dtype=jnp.float32) / math.sqrt(H)
    b2 = jax.random.normal(k4, (C_out,), dtype=jnp.float32) * 0.01
    return x, w1, b1, w2, b2


if __name__ == "__main__":
    key = jax.random.PRNGKey(0)
    k_a, k_b = jax.random.split(key, 2)

    # --- Test 1: small, NOT multiples of 8/128 (exercises channel padding,
    #     ragged token blocks and the output slice path). ---
    B, N, C_in, H = 2, 9, 40, 96
    C_out = C_in
    x, w1, b1, w2, b2 = _make_inputs(k_a, B, N, C_in, H, C_out)

    prepared = prepare_mlp_params(w1, b1, w2, b2)     # hoisted per-layer prep
    out = mlp_pallas(x, prepared)                     # exact-erf GELU (default)
    out = jax.block_until_ready(out)
    assert out.shape == (B, N, C_out)

    ref_matched = mlp_reference(x, w1, b1, w2, b2, compute_dtype=jnp.bfloat16)
    assert jnp.allclose(out, ref_matched, atol=2e-3, rtol=2e-3), \
        "mismatch vs bf16-matched reference (exact GELU)"
    ref_f32 = mlp_reference(x, w1, b1, w2, b2)
    assert jnp.allclose(out, ref_f32, atol=5e-2, rtol=5e-2), \
        "mismatch vs f32 reference (exact GELU)"

    # Optional tanh-GELU path (EUP on v6e/v7x); verified vs a matching reference.
    out_tanh = jax.block_until_ready(mlp_pallas(x, prepared, gelu_approximate=True))
    ref_tanh = mlp_reference(x, w1, b1, w2, b2, compute_dtype=jnp.bfloat16,
                             gelu_approximate=True)
    assert jnp.allclose(out_tanh, ref_tanh, atol=2e-3, rtol=2e-3), \
        "mismatch vs bf16-matched reference (tanh GELU)"

    # --- Test 2: lane-aligned channels (no pad / no slice path) + multiple
    #     hidden chunks (hk=512 over H=1024) + multi-step grid. ---
    B2, N2, C2, H2 = 2, 40, 256, 1024
    x2, w1b, b1b, w2b, b2b = _make_inputs(k_b, B2, N2, C2, H2, C2)
    out2 = jax.block_until_ready(mlp_pallas(x2, w1b, b1b, w2b, b2b))
    assert out2.shape == (B2, N2, C2)
    ref2 = mlp_reference(x2, w1b, b1b, w2b, b2b, compute_dtype=jnp.bfloat16)
    assert jnp.allclose(out2, ref2, atol=2e-3, rtol=2e-3), \
        "mismatch vs bf16-matched reference (aligned / chunked path)"

    print("KERNEL_OK")
</pallas_src>

<mosaic_0001>
module attributes {stable_mosaic.version = 11 : i64} {
  func.func @_mlp_kernel(%arg0: i32, %arg1: memref<16x128xf32, #tpu.memory_space<vmem>>, %arg2: memref<128x128xbf16, #tpu.memory_space<vmem>>, %arg3: memref<1x128xf32, #tpu.memory_space<vmem>>, %arg4: memref<128x128xbf16, #tpu.memory_space<vmem>>, %arg5: memref<1x128xf32, #tpu.memory_space<vmem>>, %arg6: memref<16x128xf32, #tpu.memory_space<vmem>>, %arg7: memref<16x128xf32, #tpu.memory_space<vmem>>) attributes {dimension_semantics = [#tpu.dimension_semantics<parallel>], iteration_bounds = array<i64: 2>, scalar_prefetch = 0 : i64, scratch_operands = 1 : i64, tpu.core_type = #tpu.core_type<tc>, window_params = [{transform_indices = @transform_0, window_bounds = array<i64: 16, 128>}, {pipeline_mode = #tpu.pipeline_mode<synchronous>, transform_indices = @transform_1, window_bounds = array<i64: 128, 128>}, {pipeline_mode = #tpu.pipeline_mode<synchronous>, transform_indices = @transform_2, window_bounds = array<i64: 1, 128>}, {pipeline_mode = #tpu.pipeline_mode<synchronous>, transform_indices = @transform_3, window_bounds = array<i64: 128, 128>}, {pipeline_mode = #tpu.pipeline_mode<synchronous>, transform_indices = @transform_4, window_bounds = array<i64: 1, 128>}, {transform_indices = @transform_5, window_bounds = array<i64: 16, 128>}]} {
    %c0 = arith.constant 0 : index
    %c0_0 = arith.constant 0 : index
    %0 = vector.load %arg1[%c0, %c0_0] : memref<16x128xf32, #tpu.memory_space<vmem>>, vector<16x128xf32>
    %1 = arith.truncf %0 : vector<16x128xf32> to vector<16x128xbf16>
    %cst = arith.constant 0.000000e+00 : f32
    %2 = vector.broadcast %cst : f32 to vector<16x128xf32>
    %c0_1 = arith.constant 0 : index
    %c0_2 = arith.constant 0 : index
    %3 = vector.load %arg7[%c0_1, %c0_2] : memref<16x128xf32, #tpu.memory_space<vmem>>, vector<16x128xf32>
    tpu.vector_store %arg7[%c0_1, %c0_2], %2 {strides = array<i32>} : memref<16x128xf32, #tpu.memory_space<vmem>>, vector<16x128xf32>,
    %c0_i32 = arith.constant 0 : i32
    %c128_i32 = arith.constant 128 : i32
    %4 = arith.muli %c0_i32, %c128_i32 : i32
    %5 = tpu.assume_multiple %4, 128 : i32
    %c0_3 = arith.constant 0 : index
    %6 = arith.index_cast %5 : i32 to index
    %7 = vector.load %arg2[%c0_3, %6] : memref<128x128xbf16, #tpu.memory_space<vmem>>, vector<128x128xbf16>
    %cst_4 = arith.constant dense<0.000000e+00> : vector<16x128xf32>
    %8 = tpu.matmul %1, %7, %cst_4 {dimension_numbers = #tpu.dot_dimension_numbers<[1], [0], [0], [1], [0, 0, 1, 1], [], []>} : vector<16x128xbf16>, vector<128x128xbf16>, vector<16x128xf32> -> vector<16x128xf32>
    %c0_5 = arith.constant 0 : index
    %9 = arith.index_cast %5 : i32 to index
    %10 = vector.load %arg3[%c0_5, %9] : memref<1x128xf32, #tpu.memory_space<vmem>>, vector<1x128xf32>
    %11 = vector.broadcast %10 : vector<1x128xf32> to vector<16x128xf32>
    %12 = arith.addf %8, %11 : vector<16x128xf32>
    %cst_6 = arith.constant 5.000000e-01 : f32
    %13 = vector.broadcast %cst_6 : f32 to vector<16x128xf32>
    %14 = arith.mulf %13, %12 : vector<16x128xf32>
    %cst_7 = arith.constant 0.707106769 : f32
    %15 = vector.broadcast %cst_7 : f32 to vector<16x128xf32>
    %16 = arith.mulf %12, %15 : vector<16x128xf32>
    %17 = math.erf %16 : vector<16x128xf32>
    %cst_8 = arith.constant 1.000000e+00 : f32
    %18 = vector.broadcast %cst_8 : f32 to vector<16x128xf32>
    %19 = arith.addf %18, %17 : vector<16x128xf32>
    %20 = arith.mulf %14, %19 : vector<16x128xf32>
    %c0_9 = arith.constant 0 : index
    %c0_10 = arith.constant 0 : index
    %21 = vector.load %arg7[%c0_9, %c0_10] : memref<16x128xf32, #tpu.memory_space<vmem>>, vector<16x128xf32>
    %22 = arith.truncf %20 : vector<16x128xf32> to vector<16x128xbf16>
    %23 = arith.index_cast %5 : i32 to index
    %c0_11 = arith.constant 0 : index
    %24 = vector.load %arg4[%23, %c0_11] : memref<128x128xbf16, #tpu.memory_space<vmem>>, vector<128x128xbf16>
    %cst_12 = arith.constant dense<0.000000e+00> : vector<16x128xf32>
    %25 = tpu.matmul %22, %24, %cst_12 {dimension_numbers = #tpu.dot_dimension_numbers<[1], [0], [0], [1], [0, 0, 1, 1], [], []>} : vector<16x128xbf16>, vector<128x128xbf16>, vector<16x128xf32> -> vector<16x128xf32>
    %26 = arith.addf %21, %25 : vector<16x128xf32>
    %c0_13 = arith.constant 0 : index
    %c0_14 = arith.constant 0 : index
    %27 = vector.load %arg7[%c0_13, %c0_14] : memref<16x128xf32, #tpu.memory_space<vmem>>, vector<16x128xf32>
    tpu.vector_store %arg7[%c0_13, %c0_14], %26 {strides = array<i32>} : memref<16x128xf32, #tpu.memory_space<vmem>>, vector<16x128xf32>,
    %c1_i32 = arith.constant 1 : i32
    %c0_15 = arith.constant 0 : index
    %c0_16 = arith.constant 0 : index
    %28 = vector.load %arg7[%c0_15, %c0_16] : memref<16x128xf32, #tpu.memory_space<vmem>>, vector<16x128xf32>
    %c0_17 = arith.constant 0 : index
    %c0_18 = arith.constant 0 : index
    %29 = vector.load %arg5[%c0_17, %c0_18] : memref<1x128xf32, #tpu.memory_space<vmem>>, vector<1x128xf32>
    %30 = vector.broadcast %29 : vector<1x128xf32> to vector<16x128xf32>
    %31 = arith.addf %28, %30 : vector<16x128xf32>
    %c0_19 = arith.constant 0 : index
    %c0_20 = arith.constant 0 : index
    %32 = vector.load %arg6[%c0_19, %c0_20] : memref<16x128xf32, #tpu.memory_space<vmem>>, vector<16x128xf32>
    tpu.vector_store %arg6[%c0_19, %c0_20], %31 {strides = array<i32>} : memref<16x128xf32, #tpu.memory_space<vmem>>, vector<16x128xf32>,
    return
  }
  func.func @transform_0(%arg0: i32) -> (i32, i32) {
    %c0_i32 = arith.constant 0 : i32
    %c0_i32_0 = arith.constant 0 : i32
    return %arg0, %c0_i32 : i32, i32
  }
  func.func @transform_1(%arg0: i32) -> (i32, i32) {
    %c0_i32 = arith.constant 0 : i32
    %c0_i32_0 = arith.constant 0 : i32
    %c0_i32_1 = arith.constant 0 : i32
    return %c0_i32, %c0_i32_0 : i32, i32
  }
  func.func @transform_2(%arg0: i32) -> (i32, i32) {
    %c0_i32 = arith.constant 0 : i32
    %c0_i32_0 = arith.constant 0 : i32
    %c0_i32_1 = arith.constant 0 : i32
    return %c0_i32, %c0_i32_0 : i32, i32
  }
  func.func @transform_3(%arg0: i32) -> (i32, i32) {
    %c0_i32 = arith.constant 0 : i32
    %c0_i32_0 = arith.constant 0 : i32
    %c0_i32_1 = arith.constant 0 : i32
    return %c0_i32, %c0_i32_0 : i32, i32
  }
  func.func @transform_4(%arg0: i32) -> (i32, i32) {
    %c0_i32 = arith.constant 0 : i32
    %c0_i32_0 = arith.constant 0 : i32
    %c0_i32_1 = arith.constant 0 : i32
    return %c0_i32, %c0_i32_0 : i32, i32
  }
  func.func @transform_5(%arg0: i32) -> (i32, i32) {
    %c0_i32 = arith.constant 0 : i32
    %c0_i32_0 = arith.constant 0 : i32
    return %arg0, %c0_i32 : i32, i32
  }
}

</mosaic_0001>

<bundles_post_ra>
// kernel: tpu_custom_call.1
= control target key start
LH: loop header
LB: loop body
LE: loop exit
PB: predicated region body
PF: predicated region fallthrough
CT: control target
= control target key end

     0   :  { %10 = vsyncpa [#allocation4], 0  ;;  %s1261_s0 = inlined_call_operand.hbm [shape: f32[18,128], index: 0, kind: input, shape index: {}]   ;;  %s1262_s1 = inlined_call_operand.hbm [shape: bf16[128,128], index: 1, kind: input, shape index: {}]   ;;  %s1263_s2 = inlined_call_operand.vmem [shape: f32[1,128], index: 2, kind: input, shape index: {}]   ;;  %s1264_s3 = inlined_call_operand.hbm [shape: bf16[128,128], index: 3, kind: input, shape index: {}]   ;;  %s1265_s4 = inlined_call_operand.vmem [shape: f32[1,128], index: 4, kind: input, shape index: {}]   ;;  %s1266_s5 = inlined_call_operand.hbm [shape: f32[18,128], index: 5, kind: output, shape index: {}]  }
   0x1   :  { %12 = vsyncpa [#allocation4 + $0x1], 0 }
   0x2   :  { %13 = vsyncpa [#allocation7], 0 }
   0x3   :  { %14 = vsyncpa [#allocation5], 0 }
   0x4   :  { %16 = vsyncpa [#allocation5 + $0x1], 0  ;;  %s1035_s18 = smov 0   ;;  %s1037_s19 = smov 0  }
   0x5   :  { %s1039_s20 = smov 0   ;;  %s1041_s21 = smov 0  }
   0x6 LB: > { %s1056_s22 = sadd.s32 4294967295, %s991_s21   ;;  %s653_s23 = sadd.s32 4294967294, %s991_s21   ;;  %s991_s21 = sphi %s1041_s21, %s1283_s21   ;;  %s987_s20 = sphi %s1039_s20, %s1282_s20   ;;  %s983_s19 = sphi %s1037_s19, %s1281_s19   ;;  %s979_s18 = sphi %s1035_s18, %s1280_s18  }
   0x7   : > { %s1060_s24 = sadd.s32 1, %s991_s21   ;;  %s29_s25 = sadd.s32 1, %s987_s20 }
   0x8   : > { %s26_s26 = ssub.s32 %s991_s21, %s1060_s24  ;;  %p36_p0 = scmp.ne.s32.totalorder %s987_s20, %s983_s19 }
   0x9   : > { %p27_p1 = scmp.eq.s32.totalorder %s26_s26, 0  ;;  %p37_p2 = scmp.eq.s32.totalorder %s991_s21, 0 }
   0xa   : > { %p42_p3 = scmp.ne.s32.totalorder %s983_s19, %s979_s18  ;;  %p1267_p4 = scmp.eq.s32.totalorder %s1056_s22, 0 }
   0xb   : > { %s1072_s27 = scalar_select %p27_p1, %s987_s20, %s29_s25  }
   0xc   : > { %p1074_p5 = por %p37_p2, %p36_p0  ;;  %p1080_p6 = por %p1267_p4, %p42_p3 }
   0xd   : > { %p150_p7 = scmp.eq.s32.totalorder %s1056_s22, 1  ;;  %p156_p8 = scmp.eq.s32.totalorder %s653_s23, 1 }
   0xe   : > { %s1270_s29 = scalar_select %p1080_p6, 1, 0 }
   0xf   : > { %p654_p9 = scmp.ge.s32.totalorder %s991_s21, 1  ;;  %p163_p10 = scmp.lt.s32.totalorder %s991_s21, 3 }
  0x10   : > { %p1087_p11 = por %p150_p7, %p36_p0  ;;  %p1091_p12 = por %p156_p8, %p42_p3 }
  0x11   : > { %p1095_p13 = pnand %p654_p9, %p163_p10  ;;  %s993_s8 = smov [#allocation6]  }
  0x12   : > { %s1271_s30 = scalar_select %p1087_p11, 1, 0 }
  0x13   : > { %s1272_s6 = scalar_select %p1091_p12, 1, 0 }
  0x14   : > { %p767_p1 = pneg %p1095_p13  ;;  %s175_s9 = sshll.u32 %s993_s8, 4  ;;  %s176_s9 = int_to_ptr.vmem [resolvable:$true] %s175_s9 }
  0x15   : > { %s994_s11 = smov [#allocation8]   ;;  %s856_s13 = scalar_lea.vmem %s176_s9, 1024 }
  0x16   : > { %p1103_p2 = pnand %p767_p1, %p1267_p4  ;;  %s191_s12 = sshll.u32 %s994_s11, 4  ;;  %s192_s12 = int_to_ptr.vmem [resolvable:$true] %s191_s12 }
  0x17   : > { %p857_p3 = scmp.ne.s32.totalorder %s176_s9, %s856_s13  ;;  %p864_p9 = scmp.lt.s32.totalorder %s176_s9, %s176_s9 }
  0x18   : > { %p847_p0 = pneg %p1103_p2  ;;  %p865_p10 = scmp.lt.s32.totalorder %s856_s13, %s856_s13 }
  0x1a   : > { %p859_p7 = pnand %p857_p3, %p847_p0  ;;  %p866_p12 = por %p865_p10, %p864_p9 }
  0x1c   : > { %p860_p8 = pneg %p859_p7 }
  0x1e   : > { %p867_p1 = pnand %p866_p12, %p860_p8 }
  0x20   : > { %870 = shalt.err (!%p867_p1)
}
  0x21   : > { %s995_s14 = smov 64   ;;  %s996_s15 = smov 4  }
  0x22   : > { %770 = dma.hbm_to_vmem [thread:$0]  (!%p1103_p2), %s1262_s1, 1024, %s176_s9, [#allocation7], %s995_s14, %s995_s14, %s996_s15  }
  0x23   : > { %s882_s23 = scalar_lea.vmem %s192_s12, 1024  ;;  %p890_p11 = scmp.lt.s32.totalorder %s192_s12, %s192_s12 }
  0x24   : > { %p883_p4 = scmp.ne.s32.totalorder %s192_s12, %s882_s23  ;;  %p891_p6 = scmp.lt.s32.totalorder %s882_s23, %s882_s23 }
  0x26   : > { %p885_p3 = pnand %p883_p4, %p847_p0  ;;  %p892_p9 = por %p891_p6, %p890_p11 }
  0x28   : > { %p886_p7 = pneg %p885_p3 }
  0x2a   : > { %p893_p12 = pnand %p892_p9, %p886_p7 }
  0x2c   : > { %896 = shalt.err (!%p893_p12)
}
  0x2d   : > { %773 = dma.hbm_to_vmem [thread:$0]  (!%p1103_p2), %s1264_s3, 1024, %s192_s12, [#allocation7], %s995_s14, %s995_s14, %s996_s15  }
  0x2e   : > { %p657_p8 = scmp.ge.s32.totalorder %s991_s21, 2 }
  0x30   : > { %204 = sbr.rel (%p657_p8) target bundleno = 85 (0x55), region = 32 }
  0x35   : > { %207 = sbr.rel (!%p1074_p5) target bundleno = 85 (0x55), region = 36  ;;  %s208_s8 = sand.u32 (%p1074_p5), 1, %s987_s20  }
  0x36   : > { %s659_s9 = sshll.u32 (%p1074_p5), %s991_s21, 1  ;;  %s658_s11 = sshll.u32 (%p1074_p5), %s208_s8, 4 }
  0x37   : > { %s214_s13 = ssub.s32 (%p1074_p5), 3, %s659_s9  ;;  %s1135_s14 = scalar_lea.sflag (%p1074_p5), [#allocation4], %s208_s8 }
  0x38   : > { %p215_p4 = scmp.lt.s32.totalorder (%p1074_p5), %s214_s13, 2  ;;  %s212_s15 = scalar_lea.vmem (%p1074_p5), [#allocation3], %s658_s11 }
  0x3a   : > { %s1285_s13 = smov (!%p215_p4, %s214_s13), 2 }
  0x3b   : > { %s1132_s10 = sshll.u32 %s1285_s13, 7 }
  0x3c   : > { %s219_s12 = ssub.s32 256, %s1132_s10 }
  0x3d   : > { %220 = vsyncadd %s1135_s14, %s219_s12  ;;  %p661_p5 = scmp.ne.s32.totalorder %s1132_s10, 0  ;;  %s697_s28 = sshll.u32 %s991_s21, 8 }
  0x3e   : > { %s1143_s23 = scalar_lea.hbm %s1261_s0, %s697_s28  ;;  %s225_s25 = sshll.u32 %s212_s15, 4  ;;  %s1145_s25 = int_to_ptr.vmem [resolvable:$true] %s225_s25 }
  0x3f   : > { %s897_s26 = scalar_lea.hbm %s1143_s23, %s1132_s10  ;;  %s901_s11 = scalar_lea.hbm %s1261_s0, 384 }
  0x40   : > { %p898_p6 = scmp.ne.s32.totalorder %s1143_s23, %s897_s26  ;;  %p902_p0 = scmp.lt.s32.totalorder %s1143_s23, %s1261_s0 }
  0x41   : > { %p903_p10 = scmp.lt.s32.totalorder %s901_s11, %s897_s26 }
  0x42   : > { %p899_p11 = pnand %p898_p6, %p661_p5 }
  0x43   : > { %p904_p1 = por %p903_p10, %p902_p0 }
  0x44   : > { %p900_p2 = pneg %p899_p11 }
  0x46   : > { %p905_p3 = pnand %p904_p1, %p900_p2 }
  0x48   : > { %908 = shalt.err (!%p905_p3)
}
  0x49   : > { %s909_s15 = scalar_lea.vmem %s1145_s25, %s1132_s10  ;;  %s997_s28 = smov [#allocation3]  }
  0x4a   : > { %p910_p7 = scmp.ne.s32.totalorder %s1145_s25, %s909_s15  ;;  %s913_s16 = sshll.u32 %s997_s28, 4  ;;  %s914_s16 = int_to_ptr.vmem [resolvable:$false] %s913_s16 }
  0x4b   : > { %s915_s17 = scalar_lea.vmem %s914_s16, 512  ;;  %p916_p4 = scmp.lt.s32.totalorder %s1145_s25, %s914_s16 }
  0x4c   : > { %p911_p9 = pnand %p910_p7, %p661_p5  ;;  %p917_p6 = scmp.lt.s32.totalorder %s915_s17, %s909_s15 }
  0x4e   : > { %p912_p12 = pneg %p911_p9  ;;  %p918_p11 = por %p917_p6, %p916_p4 }
  0x50   : > { %p919_p0 = pnand %p918_p11, %p912_p12 }
  0x52   : > { %922 = shalt.err (!%p919_p0)
}
  0x53   : > { %s998_s26 = smov 128   ;;  %s999_s8 = smov 8  }
  0x54   : > { %231 = dma.hbm_to_vmem [thread:$0]  (%p661_p5), %s1143_s23, %s1132_s10, %s1145_s25, %s1135_s14, %s998_s26, %s998_s26, %s999_s8  }
  0x55 PF: > { %237 = sbr.rel (%p1095_p13) target bundleno = 576 (0x240), region = 40  ;;  %s1174_s9 = sand.u32 (!%p1095_p13), 1, %s983_s19  }
  0x56   : > { %s666_s11 = sshll.u32 (!%p1095_p13), %s1174_s9, 4  ;;  %s240_s13 = scalar_lea.sflag (!%p1095_p13), [#allocation4], %s1174_s9 }
  0x57   : > { %s1180_s12 = scalar_lea.vmem (!%p1095_p13), [#allocation3], %s666_s11  ;;  %p1275_p2 = scmp.ne.s32.totalorder (!%p1095_p13), %s1270_s29, 0 }
  0x5a   : > { %966 = dma.done.wait (%p1275_p2), %s240_s13, 256  }
  0x5b   : > { %968 = vsyncadd (%p1275_p2), %s240_s13, 4294967040  ;;  %p1276_p5 = scmp.eq.s32.totalorder %s1056_s22, 0 }
  0x5d   : > { %970 = dma.done.wait (%p1276_p5), [#allocation7], 2048   ;;  %p1277_p13 = pmov %p1276_p5 }
  0x5e   : > { %v1000_v0 = vmov 0.0   ;;  %vm1001_vm0 = vmmov 0   ;;  %v825_v1 = vld [vmem:[#allocation6 + $0x38] sm:$0xff]   ;;  %v826_v2 = vld [vmem:[#allocation6 + $0x30] sm:$0xff]   ;;  %v827_v3 = vld [vmem:[#allocation6 + $0x28] sm:$0xff]   ;;  %s277_s23 = scalar_lea.vmem [#allocation9], %s666_s11 }
  0x5f   : > { %972 = vsyncadd (%p1277_p13), [#allocation7], 4294965248  ;;  %717 = vmatprep.subr.bf16.mxu0 %v1000_v0  ;;  %733 = vmatprep.mubr.msk.bf16.mxu0 %vm1001_vm0, %v1000_v0  ;;  %v828_v4 = vld [vmem:[#allocation6 + $0x20] sm:$0xff]   ;;  %v833_v5 = vld [vmem:[#allocation8 + $0x38] sm:$0xff]   ;;  %s542_s25 = scalar_lea.sflag [#allocation5], %s1174_s9  ;;  %p1278_p10 = scmp.ne.s32.totalorder %s1271_s30, 0 }
  0x60   : > { %737 = vmatprep.subr.bf16.mxu1 %v1000_v0  ;;  %753 = vmatprep.mubr.msk.bf16.mxu1 %vm1001_vm0, %v1000_v0  ;;  %v829_v6 = vld [vmem:[#allocation6 + $0x18] sm:$0xff]   ;;  %v830_v7 = vld [vmem:[#allocation6 + $0x10] sm:$0xff]   ;;  %v831_v8 = vld [vmem:[#allocation6 + $0x8] sm:$0xff]   ;;  %s689_s15 = sshll.u32 (%p1278_p10), %s1056_s22, 1 }
  0x61   : > { %718 = vmatpush3.bf16.msra.mxu0 %v825_v1  ;;  %738 = vmatpush3.bf16.msra.mxu1 %v833_v5  ;;  %v832_v9 = vld [vmem:[#allocation6] sm:$0xff]   ;;  %v290_v11 = vld [vmem:[%s1180_s12 + $0x8] sm:$0xff]  ;;  %v834_v13 = vld [vmem:[#allocation8 + $0x30] sm:$0xff]   ;;  %s550_s28 = ssub.s32 (%p1278_p10), 3, %s689_s15 }
  0x62   : > { %719 = vmatprep.subr.bf16.mxu0 %v1000_v0  ;;  %739 = vmatprep.subr.bf16.mxu1 %v1000_v0  ;;  %v289_v10 = vld [vmem:[%s1180_s12] sm:$0xff]  ;;  %v835_v14 = vld [vmem:[#allocation8 + $0x28] sm:$0xff]   ;;  %v837_v16 = vld [vmem:[#allocation8 + $0x18] sm:$0xff]   ;;  %p551_p1 = scmp.lt.s32.totalorder (%p1278_p10), %s550_s28, 2 }
  0x63   : > { %v291_v12 = vpack.c.bf16 %v290_v11, %v289_v10  ;;  %v836_v15 = vld [vmem:[#allocation8 + $0x20] sm:$0xff]   ;;  %v838_v17 = vld [vmem:[#allocation8 + $0x10] sm:$0xff]   ;;  %v839_v18 = vld [vmem:[#allocation8 + $0x8] sm:$0xff]  }
  0x64   : > { %v840_v19 = vld [vmem:[#allocation8] sm:$0xff]  }
  0x65   : > { %720 = vmatpush3.bf16.msra.mxu0 %v826_v2  ;;  %740 = vmatpush3.bf16.msra.mxu1 %v834_v13  ;;  %v670_v20 = vld [vmem:[%s1263_s2] ss:$0 sm:$0xff] }
  0x66   : > { %721 = vmatprep.subr.bf16.mxu0 %v1000_v0  ;;  %741 = vmatprep.subr.bf16.mxu1 %v1000_v0  ;;  %v687_v38 = vld [vmem:[%s1265_s4] ss:$0 sm:$0xff] }
  0x69   : > { %722 = vmatpush3.bf16.msra.mxu0 %v827_v3  ;;  %742 = vmatpush3.bf16.msra.mxu1 %v835_v14 }
  0x6a   : > { %723 = vmatprep.subr.bf16.mxu0 %v1000_v0  ;;  %743 = vmatprep.subr.bf16.mxu1 %v1000_v0 }
  0x6d   : > { %724 = vmatpush3.bf16.msra.mxu0 %v828_v4  ;;  %744 = vmatpush3.bf16.msra.mxu1 %v836_v15 }
  0x6e   : > { %725 = vmatprep.subr.bf16.mxu0 %v1000_v0  ;;  %745 = vmatprep.subr.bf16.mxu1 %v1000_v0 }
  0x71   : > { %726 = vmatpush3.bf16.msra.mxu0 %v829_v6  ;;  %746 = vmatpush3.bf16.msra.mxu1 %v837_v16 }
  0x72   : > { %727 = vmatprep.subr.bf16.mxu0 %v1000_v0  ;;  %747 = vmatprep.subr.bf16.mxu1 %v1000_v0 }
  0x75   : > { %728 = vmatpush3.bf16.msra.mxu0 %v830_v7  ;;  %748 = vmatpush3.bf16.msra.mxu1 %v838_v17 }
  0x76   : > { %729 = vmatprep.subr.bf16.mxu0 %v1000_v0  ;;  %749 = vmatprep.subr.bf16.mxu1 %v1000_v0 }
  0x79   : > { %730 = vmatpush3.bf16.msra.mxu0 %v831_v8  ;;  %750 = vmatpush3.bf16.msra.mxu1 %v839_v18 }
  0x7a   : > { %731 = vmatprep.subr.bf16.mxu0 %v1000_v0  ;;  %751 = vmatprep.subr.bf16.mxu1 %v1000_v0 }
  0x7d   : > { %732 = vmatpush3.bf16.msra.mxu0 %v832_v9  ;;  %752 = vmatpush3.bf16.msra.mxu1 %v840_v19 }
  0x80   : > { %734 = vmatmul.mubr.bf16.vlgmr.msra.gmra.mxu0 %v291_v12 }
 0x140   : > { %v399_v21 = vpop.f32.mrf.mxu0 }
 0x141   : > { %v400_v22 = vadd.f32 %v670_v20, %v399_v21 }
 0x142   : > { %v735_v23 = vpop.f32.mrf.mxu0 }
 0x143   : > { %v408_v24 = vmul.f32 0.70710677, %v400_v22  ;;  %v406_v32 = vmul.f32 0.5, %v400_v22 }
 0x144   : > { %v402_v25 = vpop.f32.mrf.mxu0 }
 0x145   : > { %841 = verf.f32 %v408_v24  ;;  %v403_v26 = vadd.f32 %v670_v20, %v402_v25 }
 0x146   : > { %v736_v27 = vpop.f32.mrf.mxu0 }
 0x147   : > { %v409_v28 = vmul.f32 0.70710677, %v403_v26  ;;  %v407_v33 = vmul.f32 0.5, %v403_v26 }
 0x149   : > { %843 = verf.f32 %v409_v28 }
 0x152   : > { %v842_v29 = vpop.eup %841 }
 0x153   : > { %v412_v30 = vadd.f32 1.0, %v842_v29 }
 0x155   : > { %v414_v35 = vmul.f32 %v412_v30, %v406_v32 }
 0x156   : > { %v844_v31 = vpop.eup %843 }
 0x157   : > { %v413_v34 = vadd.f32 1.0, %v844_v31 }
 0x159   : > { %v415_v36 = vmul.f32 %v413_v34, %v407_v33 }
 0x15b   : > { %v418_v37 = vpack.c.bf16 %v415_v36, %v414_v35 }
 0x15d   : > { %754 = vmatmul.mubr.bf16.vlgmr.msra.gmra.mxu1 %v418_v37 }
 0x21d   : > { %v517_v39 = vpop.f32.mrf.mxu1 }
 0x21e   : > { %v537_v40 = vadd.f32 %v687_v38, %v517_v39 }
 0x21f   : > { %v755_v41 = vpop.f32.mrf.mxu1 }
 0x220   : > { %539 = vst [vmem:[%s277_s23] sm:$0xff] %v537_v40  ;;  %548 = sbr.rel (!%p1278_p10) target bundleno = 576 (0x240), region = 56 }
 0x221   : > { %v520_v42 = vpop.f32.mrf.mxu1 }
 0x222   : > { %v538_v43 = vadd.f32 %v687_v38, %v520_v42 }
 0x223   : > { %v756_v44 = vpop.f32.mrf.mxu1 }
 0x224   : > { %540 = vst [vmem:[%s277_s23 + $0x8] sm:$0xff] %v538_v43 }
 0x225   : > { %s1287_s28 = smov (!%p551_p1, %s550_s28), 2 }
 0x226   : > { %s1204_s16 = sshll.u32 %s1287_s28, 7 }
 0x227   : > { %s555_s17 = ssub.s32 256, %s1204_s16 }
 0x228   : > { %556 = vsyncadd %s542_s25, %s555_s17  ;;  %p691_p3 = scmp.ne.s32.totalorder %s1204_s16, 0  ;;  %s698_s26 = sshll.u32 %s1056_s22, 8 }
 0x229   : > { %s1214_s11 = scalar_lea.hbm %s1266_s5, %s698_s26  ;;  %s561_s13 = sshll.u32 %s277_s23, 4  ;;  %s1216_s13 = int_to_ptr.vmem [resolvable:$true] %s561_s13 }
 0x22a   : > { %s923_s12 = scalar_lea.vmem %s1216_s13, %s1204_s16  ;;  %s1002_s29 = smov [#allocation9]  }
 0x22b   : > { %p924_p7 = scmp.ne.s32.totalorder %s1216_s13, %s923_s12  ;;  %s927_s7 = sshll.u32 %s1002_s29, 4  ;;  %s928_s7 = int_to_ptr.vmem [resolvable:$false] %s927_s7 }
 0x22c   : > { %s929_s22 = scalar_lea.vmem %s928_s7, 512  ;;  %p930_p4 = scmp.lt.s32.totalorder %s1216_s13, %s928_s7 }
 0x22d   : > { %p925_p9 = pnand %p924_p7, %p691_p3  ;;  %p931_p6 = scmp.lt.s32.totalorder %s929_s22, %s923_s12 }
 0x22f   : > { %p926_p12 = pneg %p925_p9  ;;  %p932_p11 = por %p931_p6, %p930_p4 }
 0x231   : > { %p933_p0 = pnand %p932_p11, %p926_p12 }
 0x233   : > { %936 = shalt.err (!%p933_p0)
}
 0x234   : > { %s937_s10 = scalar_lea.hbm %s1214_s11, %s1204_s16  ;;  %s941_s15 = scalar_lea.hbm %s1266_s5, 384 }
 0x235   : > { %p938_p2 = scmp.ne.s32.totalorder %s1214_s11, %s937_s10  ;;  %p942_p10 = scmp.lt.s32.totalorder %s1214_s11, %s1266_s5 }
 0x236   : > { %p943_p1 = scmp.lt.s32.totalorder %s941_s15, %s937_s10 }
 0x237   : > { %p939_p5 = pnand %p938_p2, %p691_p3 }
 0x238   : > { %p944_p7 = por %p943_p1, %p942_p10 }
 0x239   : > { %p940_p13 = pneg %p939_p5 }
 0x23b   : > { %p945_p9 = pnand %p944_p7, %p940_p13 }
 0x23d   : > { %948 = shalt.err (!%p945_p9)
}
 0x23e   : > { %s1003_s26 = smov 128   ;;  %s1004_s30 = smov 8  }
 0x23f   : > { %567 = dma.vmem_to_hbm [thread:$0]  (%p691_p3), %s1216_s13, %s1204_s16, %s1214_s11, %s542_s25, %s1003_s26, %s1003_s26, %s1004_s30  }
 0x240 PF: > { %s576_s8 = sand.u32 1, %s979_s18   ;;  %p1279_p12 = scmp.ne.s32.totalorder %s1272_s6, 0 }
 0x241   : > { %s577_s12 = scalar_lea.sflag [#allocation5], %s576_s8 }
 0x242   : > { %p775_p4 = pnand %p657_p8, %p1279_p12 }
 0x244   : > { %p776_p6 = pneg %p775_p4 }
 0x246   : > { %974 = dma.done.wait (%p776_p6), %s577_s12, 256  }
 0x247   : > { %976 = vsyncadd (%p776_p6), %s577_s12, 4294967040  ;;  %p19_p11 = scmp.ge.s32.totalorder %s1060_s24, 4   ;;  %s1280_s18 = smov %s983_s19 }
 0x248   : > { %s1281_s19 = smov %s987_s20  ;;  %s1282_s20 = smov %s1072_s27 }
 0x249   : > { %s1283_s21 = smov %s1060_s24  ;;  %21 = sbr.rel (!%p19_p11) target bundleno = 6 (0x6), region = 93 }
 0x24e   :  { %582 = vsyncpa [#allocation4], 1 }
 0x24f   :  { %584 = vsyncpa [#allocation4 + $0x1], 1 }
 0x250   :  { %585 = vsyncpa [#allocation7], 1 }
 0x251   :  { %586 = vsyncpa [#allocation5], 1 }
 0x252   :  { %588 = vsyncpa [#allocation5 + $0x1], 1 }

</bundles_post_ra>
